<compile_context>
chip_gen: v7x
topology: tpu7x:2x2x1
jax: 0.10.0
libtpu: 0.0.40
codegen_flags: <defaults>
</compile_context>

<pallas_src>
import functools

import jax
import jax.numpy as jnp
from jax import lax
from jax.experimental import pallas as pl
from jax.experimental.pallas import tpu as pltpu


# ---------------------------------------------------------------------------
# VMEM budget / tiling helpers.
# ---------------------------------------------------------------------------
def _vmem_limit_bytes():
    """~75% of physical VMEM: ~96 MiB on v5e/v6e (128 MiB phys), ~48 MiB on v7x."""
    try:
        cap = getattr(pltpu.get_tpu_info(), "vmem_capacity_bytes", None)
        if cap:
            return int(cap) * 3 // 4
    except Exception:
        pass
    return 48 * 1024 * 1024          # safe fallback on every generation


def _largest_aligned_divisor(total, cap, align):
    """Largest block <= cap that divides `total` and is a multiple of `align`;
    falls back to `total` itself when no such block exists."""
    if total <= cap:
        return total
    best = None
    hi = (min(cap, total) // align) * align
    for cand in range(align, hi + 1, align):
        if total % cand == 0:
            best = cand
    return best if best is not None else total


def _auto_tl_block(TL, S, SL, D, T, Dout, in_itemsize, align, vmem_budget):
    """Pick the largest test tile whose (double-buffered) footprint fits the budget."""
    fixed = (2 * in_itemsize * (S * SL * D + T * S * SL + D * Dout)
             + 2 * 4 * (Dout + T * Dout))                 # sup/tgt/wf/bf + proto out
    per_row = 2 * (S * D * in_itemsize + Dout * 4)        # test tile rows + tmean rows
    avail = max(int(vmem_budget * 0.8) - fixed, per_row * align)
    cap = max(align, avail // per_row)
    return _largest_aligned_divisor(TL, cap, align)


def _auto_sim_tl_block(TL, T, Dout, R, vmem_budget):
    fixed = 2 * 4 * (2 * T * Dout + Dout * R)             # proto + label_pad + M
    per_row = 2 * 4 * (Dout + T)                          # tmean rows + score columns
    avail = max(int(vmem_budget * 0.8) - fixed, per_row * 128)
    cap = max(128, avail // per_row)
    return _largest_aligned_divisor(TL, cap, 128)         # lane-dense partial tiles


# ---------------------------------------------------------------------------
# Kernel 1 (fused): prototype reps + projected-test mean.
#   prototype[b, t, :] = sum_l targets[b,l,t] * tanh(f_theta(support[b,l,:]))
#                        / (sum_l targets[b,l,t] + 1e-4)      (l runs over S*SL)
#   test_mean[b, q, :] = mean_s tanh(f_theta(test[b,s,q,:]))
# grid = (B, n_tl); B is "parallel" (megacore); the test-tile axis is "arbitrary"
# because the prototype output block is revisited along it.
# ---------------------------------------------------------------------------
def _proto_test_kernel(sup_ref, tgt_ref, test_ref, wf_ref, bf_ref,
                       proto_ref, tmean_ref, *, support_size):
    S = support_size
    wf = wf_ref[...]                                      # (D, Dout)  mxu dtype
    bf = bf_ref[...]                                      # (1, Dout)  f32

    # --- prototypes: computed once per batch, at test-tile index 0 ------------
    @pl.when(pl.program_id(1) == 0)
    def _():
        sup = sup_ref[0]                                  # (S*SL, D)
        tgt_t = tgt_ref[0]                                # (T, S*SL) 0/1, lane axis long
        sproj = jnp.tanh(
            jnp.dot(sup, wf, preferred_element_type=jnp.float32) + bf)   # (S*SL, Dout)
        # Un-normalized prototype: one MXU call, standard dim-1 contraction.
        proto_un = jnp.dot(tgt_t, sproj.astype(tgt_t.dtype),
                           preferred_element_type=jnp.float32)           # (T, Dout)
        # Tag counts via a lane-axis reduce -> (T, 1); normalize AFTER the matmul
        # (O(T*Dout) instead of the old O(S*SL*T) pre-scale).  approx reciprocal
        # runs on the otherwise-idle EUP slot.
        cnt = jnp.sum(tgt_t.astype(jnp.float32), axis=1, keepdims=True)  # (T, 1)
        inv = pl.reciprocal(cnt + 1e-4, approx=True)
        proto_ref[0] = (proto_un * inv).astype(proto_ref.dtype)

    # --- projected test reps, mean over the support dimension -----------------
    tst = test_ref[0]                                     # (S, tl, D)
    tl, d = tst.shape[1], tst.shape[2]
    tproj = jnp.tanh(
        jnp.dot(tst.reshape(S * tl, d), wf,
                preferred_element_type=jnp.float32) + bf)                # (S*tl, Dout)
    tmean_ref[0] = (tproj.reshape(S, tl, -1).sum(axis=0)
                    * (1.0 / S)).astype(tmean_ref.dtype)


def compute_proto_and_test_mean(support_reps, support_targets, test_reps, wf, bf,
                                *, mxu_input_dtype=jnp.bfloat16, tl_block=None):
    """Returns (prototype_reps (B,T,Dout) f32, test_mean (B,TL,Dout) f32)."""
    B, S, TL, D = test_reps.shape
    SL = support_reps.shape[2]
    T = support_targets.shape[-1]
    Dout = wf.shape[1]

    itemsize = jnp.dtype(mxu_input_dtype).itemsize
    align = 16 if itemsize < 4 else 8                     # bf16 sublane packing
    vmem_budget = _vmem_limit_bytes()
    if tl_block is None:
        tl_block = _auto_tl_block(TL, S, SL, D, T, Dout, itemsize, align, vmem_budget)
    tl_block = min(tl_block, TL)
    assert TL % tl_block == 0, "tl_block must divide test_seq_len"
    if tl_block != TL:
        assert tl_block % align == 0, "tl_block must be sublane-aligned"
    n_tl = TL // tl_block

    # Flatten (S, SL) and pre-transpose the one-hot targets so their lane axis is
    # the long S*SL axis.  Optional bf16 cast of MXU inputs (one-hot 0/1 is exact
    # in bf16; all accumulation stays f32 via preferred_element_type).
    sup2 = support_reps.reshape(B, S * SL, D).astype(mxu_input_dtype)
    tgt_t = jnp.transpose(support_targets.reshape(B, S * SL, T),
                          (0, 2, 1)).astype(mxu_input_dtype)
    tst = test_reps.astype(mxu_input_dtype)
    wf_c = wf.astype(mxu_input_dtype)
    bf_c = bf.astype(jnp.float32).reshape(1, Dout)

    kernel = functools.partial(_proto_test_kernel, support_size=S)
    return pl.pallas_call(
        kernel,
        out_shape=(jax.ShapeDtypeStruct((B, T, Dout), jnp.float32),
                   jax.ShapeDtypeStruct((B, TL, Dout), jnp.float32)),
        grid_spec=pltpu.PrefetchScalarGridSpec(
            num_scalar_prefetch=0,
            grid=(B, n_tl),
            in_specs=[
                pl.BlockSpec((1, S * SL, D), lambda b, t: (b, 0, 0)),
                pl.BlockSpec((1, T, S * SL), lambda b, t: (b, 0, 0)),
                pl.BlockSpec((1, S, tl_block, D), lambda b, t: (b, 0, t, 0)),
                pl.BlockSpec((D, Dout), lambda b, t: (0, 0)),
                pl.BlockSpec((1, Dout), lambda b, t: (0, 0)),
            ],
            out_specs=[
                pl.BlockSpec((1, T, Dout), lambda b, t: (b, 0, 0)),
                pl.BlockSpec((1, tl_block, Dout), lambda b, t: (b, t, 0)),
            ],
        ),
        compiler_params=pltpu.CompilerParams(
            dimension_semantics=("parallel", "arbitrary"),
            vmem_limit_bytes=vmem_budget),
    )(sup2, tgt_t, tst, wf_c, bf_c)


# ---------------------------------------------------------------------------
# Kernel 2: TapNet projection into M, dot-product similarity and the
# 2*sim + log(sum(exp(-sim))) score, tiled over the test axis.  Emitted
# TRANSPOSED (T, tl) so the lane axis is the long test axis (lane-dense stores);
# transposed back once in the XLA wrapper.  The LSE runs over the tag axis, so
# per-test-tile results are exact.  grid = (B, n_tl), both axes "parallel".
# ---------------------------------------------------------------------------
def _sim_kernel(tmean_ref, proto_ref, lpad_ref, m_ref, out_ref, *, mix_r):
    tmean = tmean_ref[0]                                        # (tl, Dout)
    proto = mix_r * proto_ref[0] + (1.0 - mix_r) * lpad_ref[0]  # (T, Dout) tiny, per tile
    m = m_ref[0]                                                # (Dout, Rpad), zero-padded

    pt = jnp.dot(tmean, m, preferred_element_type=jnp.float32)  # (tl, Rpad)
    pp = jnp.dot(proto, m, preferred_element_type=jnp.float32)  # (T, Rpad)

    # sim_func = reps_dot, computed transposed: (T, tl)
    sim_t = lax.dot_general(pp, pt, (((1,), (1,)), ((), ())),
                            preferred_element_type=jnp.float32)

    # stable log-sum-exp over the tag axis (sublane axis here); same math as the
    # module's naive log(sum(exp(-sim))).
    neg = -sim_t
    mmax = jnp.max(neg, axis=0, keepdims=True)                  # (1, tl)
    lse = mmax + jnp.log(jnp.sum(jnp.exp(neg - mmax), axis=0, keepdims=True))
    out_ref[0] = (2.0 * sim_t + lse).astype(out_ref.dtype)


def compute_sim_scores(test_mean, proto, label_pad, M, mix_r, *, tl_block=None):
    """Returns the score transposed: (B, T, TL)."""
    B, TL, Dout = test_mean.shape
    T = proto.shape[1]
    R = M.shape[-1]

    vmem_budget = _vmem_limit_bytes()
    if tl_block is None:
        tl_block = _auto_sim_tl_block(TL, T, Dout, R, vmem_budget)
    tl_block = min(tl_block, TL)
    assert TL % tl_block == 0, "tl_block must divide test_seq_len"
    if tl_block != TL:
        assert tl_block % 128 == 0, "partial test tiles must be lane-aligned (128)"
    n_tl = TL // tl_block

    kernel = functools.partial(_sim_kernel, mix_r=float(mix_r))
    return pl.pallas_call(
        kernel,
        out_shape=jax.ShapeDtypeStruct((B, T, TL), jnp.float32),
        grid_spec=pltpu.PrefetchScalarGridSpec(
            num_scalar_prefetch=0,
            grid=(B, n_tl),
            in_specs=[
                pl.BlockSpec((1, tl_block, Dout), lambda b, t: (b, t, 0)),
                pl.BlockSpec((1, T, Dout), lambda b, t: (b, 0, 0)),
                pl.BlockSpec((1, T, Dout), lambda b, t: (b, 0, 0)),
                pl.BlockSpec((1, Dout, R), lambda b, t: (b, 0, 0)),
            ],
            out_specs=pl.BlockSpec((1, T, tl_block), lambda b, t: (b, 0, t)),
        ),
        compiler_params=pltpu.CompilerParams(
            dimension_semantics=("parallel", "parallel"),
            vmem_limit_bytes=vmem_budget),
    )(test_mean, proto, label_pad, M)


# ---------------------------------------------------------------------------
# Plain-JAX glue (tiny): phi projection, per-class error + SVD projection space M.
# ---------------------------------------------------------------------------
def phi_project(params, label_reps):
    B, no_pad, D = label_reps.shape
    Dout = params["phi_w"].shape[1]
    label = jnp.tanh(label_reps.reshape(-1, D) @ params["phi_w"] + params["phi_b"])
    return label.reshape(B, no_pad, Dout)


def build_projection_space(label, proto):
    """Per-class error + SVD projection space M (R padded to 128), plus label_reps_pad."""
    B, no_pad, Dout = label.shape
    assert no_pad >= 2, "TapNet error construction needs at least 2 non-pad tags"
    T = no_pad + 1
    lsum = jnp.sum(label, axis=1, keepdims=True) - label
    lrs = label - (1.0 / (no_pad - 1)) * lsum
    lrs = lrs / (jnp.linalg.norm(lrs, axis=-1, keepdims=True) + 1e-13)
    lrs_pad = jnp.concatenate([jnp.zeros((B, 1, Dout), lrs.dtype), lrs], axis=1)
    proto_n = proto / (jnp.linalg.norm(proto, axis=-1, keepdims=True) + 1e-13)
    err = lrs_pad - proto_n                                        # (B, T, Dout)
    _, _, vh = jnp.linalg.svd(err, full_matrices=True)             # vh: (B, Dout, Dout)
    # torch: M[i] = V[i][s_sum[i]:, :].T with V = vh^T  ->  M = vh[:, :, s_sum:]
    # TODO(synk): torch picks s_sum = count(singular values >= 1e-13) at runtime; a
    # data-dependent output shape is not expressible, so assume full rank s_sum == T.
    M = vh[:, :, T:]                                               # (B, Dout, R), R = Dout-T
    R = Dout - T
    # Zero-pad R up to a multiple of 128: zero columns of M contribute nothing to
    # the similarity but give unmasked loads / full MXU tiles in kernel 2.
    Rpad = max(pl.cdiv(max(R, 1), 128) * 128, 128)
    if Rpad > R:
        M = jnp.pad(M, ((0, 0), (0, 0), (0, Rpad - R)))
    label_pad = jnp.concatenate(
        [jnp.zeros((B, 1, Dout), label.dtype), label], axis=1)     # (B, T, Dout)
    return M, label_pad


# ---------------------------------------------------------------------------
# Full forward.
# ---------------------------------------------------------------------------
def tapnet_similarity_forward(params, test_reps, support_reps, test_output_mask,
                              support_output_mask, support_targets, label_reps,
                              *, tap_proto=True, tap_proto_r=0.7,
                              mxu_input_dtype=jnp.bfloat16, tl_block=None,
                              sim_tl_block=None):
    # mxu_input_dtype=bfloat16 by default (f32 accumulation kept via
    # preferred_element_type); pass jnp.float32 for bit-closer torch parity.
    del test_output_mask, support_output_mask   # unused by this forward (as in torch)

    label = phi_project(params, label_reps)                        # (B, T-1, Dout)

    proto, test_mean = compute_proto_and_test_mean(
        support_reps, support_targets, test_reps,
        params["f_theta_w"], params["f_theta_b"],
        mxu_input_dtype=mxu_input_dtype, tl_block=tl_block)

    M, label_pad = build_projection_space(label, proto)

    mix_r = tap_proto_r if tap_proto else 0.0
    score_t = compute_sim_scores(test_mean, proto, label_pad, M, mix_r,
                                 tl_block=sim_tl_block)            # (B, T, TL)
    # Final transpose back to the module's (B, test_len, num_tags) layout (cheap
    # for the usual small T; keep the transposed layout downstream if T >= 128).
    return jnp.transpose(score_t, (0, 2, 1))


def init_params(key, emb_dim, mlp_out_dim):
    k1, k2, k3, k4 = jax.random.split(key, 4)
    # torch xavier_normal_ on Linear.weight (out,in): std = sqrt(2/(fan_in+fan_out))
    std = (2.0 / (emb_dim + mlp_out_dim)) ** 0.5
    f_w = jax.random.normal(k1, (emb_dim, mlp_out_dim), jnp.float32) * std
    phi_w = jax.random.normal(k2, (emb_dim, mlp_out_dim), jnp.float32) * std
    bound = 1.0 / (emb_dim ** 0.5)   # torch Linear default bias init
    f_b = jax.random.uniform(k3, (1, mlp_out_dim), jnp.float32, -bound, bound)
    phi_b = jax.random.uniform(k4, (1, mlp_out_dim), jnp.float32, -bound, bound)
    return {"f_theta_w": f_w, "f_theta_b": f_b, "phi_w": phi_w, "phi_b": phi_b}


if __name__ == "__main__":
    key = jax.random.PRNGKey(0)
    B, S, TL, SL, D, T = 2, 2, 16, 16, 32, 5      # num_tags = 5 (incl. pad tag 0)
    MLP_OUT = D  # module reuses emb_dim when reshaping projected support reps

    kp, k1, k2, k3 = jax.random.split(key, 4)
    params = init_params(kp, D, MLP_OUT)

    test_reps = jax.random.normal(k1, (B, S, TL, D), jnp.float32)
    support_reps = jax.random.normal(k2, (B, S, SL, D), jnp.float32)
    label_reps = jax.random.normal(k3, (B, T - 1, D), jnp.float32)

    # deterministic one-hot targets: tag = token index mod num_tags
    tag_ids = (jnp.arange(B * S * SL) % T).reshape(B, S, SL)
    support_targets = jax.nn.one_hot(tag_ids, T, dtype=jnp.float32)

    test_output_mask = jnp.ones((B, TL), jnp.float32)
    support_output_mask = jnp.ones((B, S, SL), jnp.float32)

    # --- default (bf16 MXU inputs, f32 accumulation) forward -------------------
    out_bf16 = tapnet_similarity_forward(
        params, test_reps, support_reps, test_output_mask, support_output_mask,
        support_targets, label_reps, tap_proto=True, tap_proto_r=0.7)
    out_bf16 = jax.block_until_ready(out_bf16)
    assert out_bf16.shape == (B, TL, T), out_bf16.shape
    assert bool(jnp.all(jnp.isfinite(out_bf16)))

    # --- f32 parity mode: spot-check kernel 1 against plain-jnp math -----------
    hi = lax.Precision.HIGHEST
    wf, bf = params["f_theta_w"], params["f_theta_b"]
    proto, test_mean = compute_proto_and_test_mean(
        support_reps, support_targets, test_reps, wf, bf,
        mxu_input_dtype=jnp.float32)
    sup_p = jnp.tanh(jnp.dot(support_reps.reshape(-1, D), wf, precision=hi) + bf
                     ).reshape(B, S * SL, MLP_OUT)
    tgt2 = support_targets.reshape(B, S * SL, T)
    ref_proto = jnp.einsum("blt,bld->btd", tgt2, sup_p, precision=hi) / (
        jnp.sum(tgt2, axis=1)[..., None] + 1e-4)
    ref_tmean = jnp.tanh(jnp.dot(test_reps.reshape(-1, D), wf, precision=hi) + bf
                         ).reshape(B, S, TL, MLP_OUT).mean(axis=1)
    assert bool(jnp.allclose(test_mean, ref_tmean, atol=1e-4, rtol=1e-4))
    # prototype uses pl.reciprocal(approx=True) -> allow a little extra headroom
    assert bool(jnp.allclose(proto, ref_proto, atol=1e-2, rtol=1e-2))

    # --- end-to-end check in f32 parity mode (same glue/SVD inputs -> same M) --
    out_f32 = tapnet_similarity_forward(
        params, test_reps, support_reps, test_output_mask, support_output_mask,
        support_targets, label_reps, tap_proto=True, tap_proto_r=0.7,
        mxu_input_dtype=jnp.float32)
    label = phi_project(params, label_reps)
    M, label_pad = build_projection_space(label, proto)
    lp = 0.7 * proto + 0.3 * label_pad
    pt = jnp.einsum("bqd,bdr->bqr", ref_tmean, M, precision=hi)
    pp = jnp.einsum("btd,bdr->btr", lp, M, precision=hi)
    ref_sim = jnp.einsum("bqr,btr->bqt", pt, pp, precision=hi)
    ref_score = 2.0 * ref_sim + jnp.log(
        jnp.sum(jnp.exp(-ref_sim), axis=-1, keepdims=True))
    assert bool(jnp.allclose(out_f32, ref_score, atol=1e-3, rtol=1e-3))

    print("KERNEL_OK")
</pallas_src>

<mosaic_0001>
module attributes {stable_mosaic.version = 11 : i64} {
  func.func @_proto_test_kernel(%arg0: i32, %arg1: i32, %arg2: memref<1x32x32xbf16, #tpu.memory_space<vmem>>, %arg3: memref<1x5x32xbf16, #tpu.memory_space<vmem>>, %arg4: memref<1x2x16x32xbf16, #tpu.memory_space<vmem>>, %arg5: memref<32x32xbf16, #tpu.memory_space<vmem>>, %arg6: memref<1x32xf32, #tpu.memory_space<vmem>>, %arg7: memref<1x5x32xf32, #tpu.memory_space<vmem>>, %arg8: memref<1x16x32xf32, #tpu.memory_space<vmem>>) attributes {dimension_semantics = [#tpu.dimension_semantics<parallel>, #tpu.dimension_semantics<arbitrary>], iteration_bounds = array<i64: 2, 1>, scalar_prefetch = 0 : i64, scratch_operands = 0 : i64, tpu.core_type = #tpu.core_type<tc>, window_params = [{transform_indices = @transform_0, window_bounds = array<i64: 1, 32, 32>}, {transform_indices = @transform_1, window_bounds = array<i64: 1, 5, 32>}, {transform_indices = @transform_2, window_bounds = array<i64: 1, 2, 16, 32>}, {pipeline_mode = #tpu.pipeline_mode<synchronous>, transform_indices = @transform_3, window_bounds = array<i64: 32, 32>}, {pipeline_mode = #tpu.pipeline_mode<synchronous>, transform_indices = @transform_4, window_bounds = array<i64: 1, 32>}, {transform_indices = @transform_5, window_bounds = array<i64: 1, 5, 32>}, {transform_indices = @transform_6, window_bounds = array<i64: 1, 16, 32>}]} {
    %c0 = arith.constant 0 : index
    %c0_0 = arith.constant 0 : index
    %0 = vector.load %arg5[%c0, %c0_0] : memref<32x32xbf16, #tpu.memory_space<vmem>>, vector<32x32xbf16>
    %c0_1 = arith.constant 0 : index
    %c0_2 = arith.constant 0 : index
    %1 = vector.load %arg6[%c0_1, %c0_2] : memref<1x32xf32, #tpu.memory_space<vmem>>, vector<1x32xf32>
    %c0_i32 = arith.constant 0 : i32
    %2 = arith.cmpi eq, %arg1, %c0_i32 : i32
    %3 = arith.extui %2 : i1 to i32
    %c0_i32_3 = arith.constant 0 : i32
    %4 = arith.cmpi ne, %3, %c0_i32_3 : i32
    scf.if %4 {
      %c0_13 = arith.constant 0 : index
      %c0_14 = arith.constant 0 : index
      %c0_15 = arith.constant 0 : index
      %19 = vector.load %arg2[%c0_13, %c0_14, %c0_15] : memref<1x32x32xbf16, #tpu.memory_space<vmem>>, vector<1x32x32xbf16>
      %20 = vector.shape_cast %19 : vector<1x32x32xbf16> to vector<32x32xbf16>
      %c0_16 = arith.constant 0 : index
      %c0_17 = arith.constant 0 : index
      %c0_18 = arith.constant 0 : index
      %21 = vector.load %arg3[%c0_16, %c0_17, %c0_18] : memref<1x5x32xbf16, #tpu.memory_space<vmem>>, vector<1x5x32xbf16>
      %22 = vector.shape_cast %21 : vector<1x5x32xbf16> to vector<5x32xbf16>
      %cst_19 = arith.constant dense<0.000000e+00> : vector<32x32xf32>
      %23 = tpu.matmul %20, %0, %cst_19 {dimension_numbers = #tpu.dot_dimension_numbers<[1], [0], [0], [1], [0, 0, 1, 1], [], []>} : vector<32x32xbf16>, vector<32x32xbf16>, vector<32x32xf32> -> vector<32x32xf32>
      %24 = vector.broadcast %1 : vector<1x32xf32> to vector<32x32xf32>
      %25 = arith.addf %23, %24 : vector<32x32xf32>
      %26 = math.tanh %25 : vector<32x32xf32>
      %27 = arith.truncf %26 : vector<32x32xf32> to vector<32x32xbf16>
      %cst_20 = arith.constant dense<0.000000e+00> : vector<5x32xf32>
      %28 = tpu.matmul %22, %27, %cst_20 {dimension_numbers = #tpu.dot_dimension_numbers<[1], [0], [0], [1], [0, 0, 1, 1], [], []>} : vector<5x32xbf16>, vector<32x32xbf16>, vector<5x32xf32> -> vector<5x32xf32>
      %29 = arith.extf %22 : vector<5x32xbf16> to vector<5x32xf32>
      %cst_21 = arith.constant dense<0.000000e+00> : vector<5xf32>
      %30 = vector.multi_reduction <add>, %29, %cst_21 [1] : vector<5x32xf32> to vector<5xf32>
      %31 = vector.shape_cast %30 : vector<5xf32> to vector<5x1xf32>
      %cst_22 = arith.constant 9.99999974E-5 : f32
      %32 = vector.broadcast %cst_22 : f32 to vector<5x1xf32>
      %33 = arith.addf %31, %32 : vector<5x1xf32>
      %34 = tpu.reciprocal %33 {approx = true} : vector<5x1xf32> -> vector<5x1xf32>
      %35 = vector.broadcast %34 : vector<5x1xf32> to vector<5x32xf32>
      %36 = arith.mulf %28, %35 : vector<5x32xf32>
      %c0_23 = arith.constant 0 : index
      %c0_24 = arith.constant 0 : index
      %c0_25 = arith.constant 0 : index
      %37 = vector.load %arg7[%c0_23, %c0_24, %c0_25] : memref<1x5x32xf32, #tpu.memory_space<vmem>>, vector<1x5x32xf32>
      %38 = vector.shape_cast %37 : vector<1x5x32xf32> to vector<5x32xf32>
      %39 = vector.shape_cast %36 : vector<5x32xf32> to vector<1x5x32xf32>
      tpu.vector_store %arg7[%c0_23, %c0_24, %c0_25], %39 {strides = array<i32>} : memref<1x5x32xf32, #tpu.memory_space<vmem>>, vector<1x5x32xf32>,
    } else {
    }
    %c0_4 = arith.constant 0 : index
    %c0_5 = arith.constant 0 : index
    %c0_6 = arith.constant 0 : index
    %c0_7 = arith.constant 0 : index
    %5 = vector.load %arg4[%c0_4, %c0_5, %c0_6, %c0_7] : memref<1x2x16x32xbf16, #tpu.memory_space<vmem>>, vector<1x2x16x32xbf16>
    %6 = vector.shape_cast %5 : vector<1x2x16x32xbf16> to vector<2x16x32xbf16>
    %7 = vector.shape_cast %6 : vector<2x16x32xbf16> to vector<32x32xbf16>
    %cst = arith.constant dense<0.000000e+00> : vector<32x32xf32>
    %8 = tpu.matmul %7, %0, %cst {dimension_numbers = #tpu.dot_dimension_numbers<[1], [0], [0], [1], [0, 0, 1, 1], [], []>} : vector<32x32xbf16>, vector<32x32xbf16>, vector<32x32xf32> -> vector<32x32xf32>
    %9 = vector.broadcast %1 : vector<1x32xf32> to vector<32x32xf32>
    %10 = arith.addf %8, %9 : vector<32x32xf32>
    %11 = math.tanh %10 : vector<32x32xf32>
    %12 = vector.shape_cast %11 : vector<32x32xf32> to vector<2x16x32xf32>
    %cst_8 = arith.constant dense<0.000000e+00> : vector<16x32xf32>
    %13 = vector.multi_reduction <add>, %12, %cst_8 [0] : vector<2x16x32xf32> to vector<16x32xf32>
    %cst_9 = arith.constant 5.000000e-01 : f32
    %14 = vector.broadcast %cst_9 : f32 to vector<16x32xf32>
    %15 = arith.mulf %13, %14 : vector<16x32xf32>
    %c0_10 = arith.constant 0 : index
    %c0_11 = arith.constant 0 : index
    %c0_12 = arith.constant 0 : index
    %16 = vector.load %arg8[%c0_10, %c0_11, %c0_12] : memref<1x16x32xf32, #tpu.memory_space<vmem>>, vector<1x16x32xf32>
    %17 = vector.shape_cast %16 : vector<1x16x32xf32> to vector<16x32xf32>
    %18 = vector.shape_cast %15 : vector<16x32xf32> to vector<1x16x32xf32>
    tpu.vector_store %arg8[%c0_10, %c0_11, %c0_12], %18 {strides = array<i32>} : memref<1x16x32xf32, #tpu.memory_space<vmem>>, vector<1x16x32xf32>,
    return
  }
  func.func @transform_0(%arg0: i32, %arg1: i32) -> (i32, i32, i32) {
    %c0_i32 = arith.constant 0 : i32
    %c0_i32_0 = arith.constant 0 : i32
    %c0_i32_1 = arith.constant 0 : i32
    return %arg0, %c0_i32, %c0_i32_0 : i32, i32, i32
  }
  func.func @transform_1(%arg0: i32, %arg1: i32) -> (i32, i32, i32) {
    %c0_i32 = arith.constant 0 : i32
    %c0_i32_0 = arith.constant 0 : i32
    %c0_i32_1 = arith.constant 0 : i32
    return %arg0, %c0_i32, %c0_i32_0 : i32, i32, i32
  }
  func.func @transform_2(%arg0: i32, %arg1: i32) -> (i32, i32, i32, i32) {
    %c0_i32 = arith.constant 0 : i32
    %c0_i32_0 = arith.constant 0 : i32
    %c0_i32_1 = arith.constant 0 : i32
    return %arg0, %c0_i32, %arg1, %c0_i32_0 : i32, i32, i32, i32
  }
  func.func @transform_3(%arg0: i32, %arg1: i32) -> (i32, i32) {
    %c0_i32 = arith.constant 0 : i32
    %c0_i32_0 = arith.constant 0 : i32
    %c0_i32_1 = arith.constant 0 : i32
    return %c0_i32, %c0_i32_0 : i32, i32
  }
  func.func @transform_4(%arg0: i32, %arg1: i32) -> (i32, i32) {
    %c0_i32 = arith.constant 0 : i32
    %c0_i32_0 = arith.constant 0 : i32
    %c0_i32_1 = arith.constant 0 : i32
    return %c0_i32, %c0_i32_0 : i32, i32
  }
  func.func @transform_5(%arg0: i32, %arg1: i32) -> (i32, i32, i32) {
    %c0_i32 = arith.constant 0 : i32
    %c0_i32_0 = arith.constant 0 : i32
    %c0_i32_1 = arith.constant 0 : i32
    return %arg0, %c0_i32, %c0_i32_0 : i32, i32, i32
  }
  func.func @transform_6(%arg0: i32, %arg1: i32) -> (i32, i32, i32) {
    %c0_i32 = arith.constant 0 : i32
    %c0_i32_0 = arith.constant 0 : i32
    return %arg0, %arg1, %c0_i32 : i32, i32, i32
  }
}

</mosaic_0001>

<bundles_post_ra>
// kernel: tpu_custom_call.1
= control target key start
LH: loop header
LB: loop body
LE: loop exit
PB: predicated region body
PF: predicated region fallthrough
CT: control target
= control target key end

     0   :  { %s1423_s0 = inlined_call_operand.hbm [shape: bf16[2,32,32], index: 0, kind: input, shape index: {}]   ;;  %s1424_s1 = inlined_call_operand.vmem [shape: bf16[2,5,32], index: 1, kind: input, shape index: {}]   ;;  %s1425_s2 = inlined_call_operand.hbm [shape: bf16[2,2,16,32], index: 2, kind: input, shape index: {}]   ;;  %s1426_s3 = inlined_call_operand.vmem [shape: bf16[32,32], index: 3, kind: input, shape index: {}]   ;;  %s1427_s4 = inlined_call_operand.vmem [shape: f32[1,32], index: 4, kind: input, shape index: {}]   ;;  %s1428_s5 = inlined_call_operand.vmem [shape: f32[2,5,32], index: 5, kind: output, shape index: {0}]   ;;  %s1429_s6 = inlined_call_operand.hbm [shape: f32[2,16,32], index: 6, kind: output, shape index: {1}]  }
   0x1   :  { %1435 = sst [smem:[#allocation12_spill]] %s1423_s0 }
   0x2   :  { %12 = vsyncpa [#allocation3], 0 }
   0x3   :  { %14 = vsyncpa [#allocation3 + $0x1], 0 }
   0x4   :  { %15 = vsyncpa [#allocation6], 0 }
   0x5   :  { %17 = vsyncpa [#allocation6 + $0x1], 0 }
   0x6   :  { %18 = vsyncpa [#allocation4], 0 }
   0x7   :  { %20 = vsyncpa [#allocation4 + $0x1], 0  ;;  %s1148_s21 = smov 0   ;;  %s1150_s22 = smov 0  }
   0x8   :  { %s1152_s23 = smov 0   ;;  %s1154_s24 = smov 0  }
   0x9   :  { %s1156_s25 = smov 0   ;;  %s1158_s26 = smov 0  }
   0xa LB: > { %s786_s27 = sadd.s32 4294967295, %s1102_s26   ;;  %s787_s28 = sadd.s32 4294967294, %s1102_s26   ;;  %s1102_s26 = sphi %s1158_s26, %s26_s26   ;;  %s1098_s25 = sphi %s1156_s25, %s1456_s25   ;;  %s1094_s24 = sphi %s1154_s24, %s1455_s24   ;;  %s1090_s23 = sphi %s1152_s23, %s1454_s23   ;;  %s1086_s22 = sphi %s1150_s22, %s1453_s22   ;;  %s1082_s21 = sphi %s1148_s21, %s1452_s21  }
   0xb   : > { %s38_s29 = sadd.s32 1, %s1098_s25  ;;  %s45_s30 = sadd.s32 1, %s1090_s23 }
   0xc   : > { %p40_p0 = scmp.ge.s32.totalorder %s38_s29, 2  ;;  %p52_p1 = scmp.ne.s32.totalorder %s1090_s23, %s1086_s22 }
   0xd   : > { %p53_p2 = scmp.eq.s32.totalorder %s1102_s26, 0  ;;  %p58_p3 = scmp.ne.s32.totalorder %s1086_s22, %s1082_s21 }
   0xe   : > { %s1458_s29 = smov (%p40_p0, %s38_s29), 0  ;;  %p59_p5 = scmp.eq.s32.totalorder %s786_s27, 0 }
   0xf   : > { %1436 = sst [smem:[#allocation11_spill]] %s1458_s29  ;;  %p1189_p4 = por %p53_p2, %p52_p1 }
  0x10   : > { %s42_s8 = ssub.s32 %s1098_s25, %s1458_s29  ;;  %p206_p6 = scmp.eq.s32.totalorder %s786_s27, 1 }
  0x11   : > { %p43_p7 = scmp.eq.s32.totalorder %s42_s8, 0  ;;  %p1195_p8 = por %p59_p5, %p58_p3 }
  0x12   : > { %p1199_p9 = por %p206_p6, %p52_p1  ;;  %p212_p10 = scmp.eq.s32.totalorder %s787_s28, 1 }
  0x13   : > { %s1438_s9 = scalar_select %p1195_p8, 1, 0 }
  0x14   : > { %s1439_s10 = scalar_select %p1199_p9, 1, 0 }
  0x15   : > { %s1204_s11 = scalar_select %p43_p7, %s1090_s23, %s45_s30  }
  0x16   : > { %p1206_p11 = por %p212_p10, %p58_p3  ;;  %p876_p13 = scmp.lt.s32.totalorder %s1102_s26, 2 }
  0x17   : > { %s1213_s13 = sand.u32 1, %s1090_s23   ;;  %s820_s15 = sshll.u32 %s1098_s25, 8 }
  0x18   : > { %s1440_s12 = scalar_select %p1206_p11, 1, 0 }
  0x19   : > { %s1430_s14 = sshll.u32 %s1213_s13, 4  ;;  %s1441_s0 = sld [smem:[#allocation12_spill]] }
  0x1a   : > { %s242_s19 = scalar_lea.vmem [#allocation2], %s1430_s14  ;;  %p1230_p0 = pnand %p876_p13, %p1189_p4 }
  0x1b   : > { %s249_s20 = sshll.u32 %s242_s19, 4  ;;  %s239_s28 = scalar_lea.sflag [#allocation3], %s1213_s13  ;;  %s1226_s20 = int_to_ptr.vmem [resolvable:$true] %s249_s20 }
  0x1c   : > { %p958_p3 = pneg %p1230_p0 }
  0x1f   : > { %s1222_s18 = scalar_lea.hbm %s1441_s0, %s820_s15  ;;  %s961_s7 = scalar_lea.hbm %s1441_s0, 512 }
  0x20   : > { %s956_s30 = scalar_lea.hbm %s1222_s18, 256  ;;  %p962_p4 = scmp.lt.u32.totalorder %s1222_s18, %s1441_s0 }
  0x21   : > { %p957_p2 = scmp.ne.s32.totalorder %s1222_s18, %s956_s30  ;;  %p963_p7 = scmp.lt.u32.totalorder %s961_s7, %s956_s30 }
  0x22   : > { %p965_p13 = scmp.lt.u32.totalorder %s956_s30, %s1222_s18 }
  0x23   : > { %p959_p5 = pnand %p958_p3, %p957_p2  ;;  %p964_p10 = por %p963_p7, %p962_p4 }
  0x25   : > { %p960_p6 = pneg %p959_p5  ;;  %p966_p12 = por %p965_p13, %p964_p10 }
  0x27   : > { %p967_p1 = pnand %p966_p12, %p960_p6 }
  0x29   : > { %970 = shalt.err (!%p967_p1)
}
  0x2a   : > { %s971_s14 = scalar_lea.vmem %s1226_s20, 256  ;;  %s1104_s8 = smov [#allocation2]  }
  0x2b   : > { %p972_p2 = scmp.ne.s32.totalorder %s1226_s20, %s971_s14  ;;  %s976_s16 = sshll.u32 %s1104_s8, 4  ;;  %s977_s16 = int_to_ptr.vmem [resolvable:$false] %s976_s16 }
  0x2c   : > { %s978_s17 = scalar_lea.vmem %s977_s16, 512  ;;  %p979_p9 = scmp.lt.s32.totalorder %s1226_s20, %s977_s16 }
  0x2d   : > { %p974_p5 = pnand %p972_p2, %p958_p3  ;;  %p980_p4 = scmp.lt.s32.totalorder %s978_s17, %s971_s14 }
  0x2f   : > { %p975_p11 = pneg %p974_p5  ;;  %p981_p7 = por %p980_p4, %p979_p9 }
  0x31   : > { %p982_p10 = pnand %p981_p7, %p975_p11 }
  0x33   : > { %985 = shalt.err (!%p982_p10)
}
  0x34   : > { %s1433_s30 = smov 64   ;;  %s1106_s7 = smov 4  }
  0x35   : > { %868 = dma.hbm_to_vmem [thread:$0]  (!%p1230_p0), %s1222_s18, 256, %s1226_s20, %s239_s28, %s1433_s30, %s1433_s30, %s1106_s7  }
  0x36   : > { %p287_p9 = scmp.lt.s32.totalorder %s1102_s26, 3  ;;  %s1272_s8 = scalar_lea.hbm %s1425_s2, %s820_s15 }
  0x37   : > { %p1443_p11 = scmp.ge.s32.totalorder %s1102_s26, 1  ;;  %s1445_s17 = sshll.u32 %s1213_s13, 4 }
  0x38   : > { %s270_s0 = scalar_lea.vmem [#allocation5], %s1445_s17  ;;  %s267_s18 = scalar_lea.sflag [#allocation6], %s1213_s13 }
  0x39   : > { %p1276_p12 = pnand %p1443_p11, %p287_p9  ;;  %s279_s29 = sshll.u32 %s270_s0, 4  ;;  %s1282_s29 = int_to_ptr.vmem [resolvable:$true] %s279_s29 }
  0x3a   : > { %s986_s20 = scalar_lea.hbm %s1272_s8, 256  ;;  %s991_s14 = scalar_lea.hbm %s1425_s2, 512 }
  0x3b   : > { %p987_p1 = scmp.ne.s32.totalorder %s1272_s8, %s986_s20  ;;  %p992_p2 = scmp.lt.u32.totalorder %s1272_s8, %s1425_s2 }
  0x3c   : > { %p993_p5 = scmp.lt.u32.totalorder %s991_s14, %s986_s20  ;;  %p995_p7 = scmp.lt.u32.totalorder %s986_s20, %s1272_s8 }
  0x3d   : > { %p989_p6 = pnand %p987_p1, %p958_p3 }
  0x3e   : > { %p994_p4 = por %p993_p5, %p992_p2 }
  0x3f   : > { %p990_p13 = pneg %p989_p6 }
  0x40   : > { %p996_p10 = por %p995_p7, %p994_p4 }
  0x42   : > { %p997_p9 = pnand %p996_p10, %p990_p13 }
  0x44   : > { %1000 = shalt.err (!%p997_p9)
}
  0x45   : > { %s1001_s0 = scalar_lea.vmem %s1282_s29, 256  ;;  %s1107_s17 = smov [#allocation5]  }
  0x46   : > { %p1002_p11 = scmp.ne.s32.totalorder %s1282_s29, %s1001_s0  ;;  %s1006_s15 = sshll.u32 %s1107_s17, 4  ;;  %s1007_s15 = int_to_ptr.vmem [resolvable:$false] %s1006_s15 }
  0x47   : > { %s1008_s30 = scalar_lea.vmem %s1007_s15, 512  ;;  %p1009_p8 = scmp.lt.s32.totalorder %s1282_s29, %s1007_s15 }
  0x48   : > { %p1004_p1 = pnand %p1002_p11, %p958_p3  ;;  %p1010_p2 = scmp.lt.s32.totalorder %s1008_s30, %s1001_s0 }
  0x4a   : > { %p1005_p6 = pneg %p1004_p1  ;;  %p1011_p5 = por %p1010_p2, %p1009_p8 }
  0x4c   : > { %p1012_p4 = pnand %p1011_p5, %p1005_p6 }
  0x4e   : > { %1015 = shalt.err (!%p1012_p4)
}
  0x4f   : > { %s1446_s20 = smov 64   ;;  %291 = sbr.rel (%p1276_p12) target bundleno = 550 (0x226), region = 40 }
  0x50   : > { %871 = dma.hbm_to_vmem [thread:$0]  (!%p1230_p0), %s1272_s8, 256, %s1282_s29, %s267_s18, %s1446_s20, %s1446_s20, %s1106_s7  }
  0x51   : > { %s1316_s28 = sand.u32 (!%p1276_p12), 1, %s1086_s22   ;;  %p1447_p8 = scmp.ne.s32.totalorder (!%p1276_p12), %s1438_s9, 0 }
  0x52   : > { %s1319_s14 = sshll.u32 (!%p1276_p12), %s1316_s28, 4  ;;  %s294_s27 = scalar_lea.sflag (!%p1276_p12), [#allocation3], %s1316_s28 }
  0x53   : > { %s297_s19 = scalar_lea.vmem (!%p1276_p12), [#allocation2], %s1319_s14 }
  0x56   : > { %1069 = dma.done.wait (%p1447_p8), %s294_s27, 256  }
  0x57   : > { %1071 = vsyncadd (%p1447_p8), %s294_s27, 4294967040  ;;  %s303_s29 = scalar_lea.sflag [#allocation6], %s1316_s28  ;;  %s306_s13 = scalar_lea.vmem [#allocation5], %s1319_s14 }
  0x58   : > { %1073 = dma.done.wait (%p1447_p8), %s303_s29, 256  }
  0x59   : > { %1075 = vsyncadd (%p1447_p8), %s303_s29, 4294967040  ;;  %v932_v0 = vld [vmem:[%s1426_s3] sm:$0xff]   ;;  %v933_v1 = vld [vmem:[%s1426_s3 + $0x8] sm:$0xff]   ;;  %vm401_vm0 = vcmask 261120   ;;  %v1108_v6 = vmov 0.0   ;;  %p348_p0 = scmp.lt.s32.totalorder %s1094_s24, 1 }
  0x5a   : > { %835 = vmatprep.subr.bf16.mxu0 %v932_v0  ;;  %v934_v2 = vld [vmem:[%s297_s19] sm:$0xff]   ;;  %v935_v3 = vld [vmem:[%s297_s19 + $0x8] sm:$0xff]   ;;  %843 = vmatprep.subr.bf16.mxu1 %v1108_v6  ;;  %vm1109_vm1 = vmmov 0   ;;  %vm507_vm2 = vcmask 258048   ;;  %s347_s19 = scalar_lea.vmem [#allocation7], %s1319_s14  ;;  %s822_s29 = sshll.u32 %s1094_s24, 8 }
  0x5b   : > { %836 = vmatpush3.bf16.msra.mxu0 %v932_v0  ;;  %839 = vmatprep.mubr.msk.bf16.mxu0 %vm401_vm0, %v934_v2  ;;  %v936_v4 = vld [vmem:[%s306_s13] sm:$0xff]   ;;  %v937_v5 = vld [vmem:[%s306_s13 + $0x8] sm:$0xff]   ;;  %s1345_s9 = scalar_select %p348_p0, %s1094_s24, 1 }
  0x5c   : > { %837 = vmatprep.subr.bf16.mxu0 %v933_v1  ;;  %847 = vmatprep.mubr.msk.bf16.mxu1 %vm1109_vm1, %v1108_v6  ;;  %v823_v10 = vld [vmem:[%s1427_s4] ss:$0 sm:$0xff]  ;;  %s640_s13 = sshll.u32 %s347_s19, 4  ;;  %s1367_s16 = scalar_lea.hbm %s1429_s6, %s822_s29  ;;  %s1369_s13 = int_to_ptr.vmem [resolvable:$true] %s640_s13 }
  0x5d   : > { %s800_s0 = sshll.u32 %s1345_s9, 2  ;;  %s622_s18 = scalar_lea.sflag [#allocation4], %s1316_s28 }
  0x5e   : > { %s351_s30 = scalar_lea.vmem %s1424_s1, %s800_s0  ;;  %s1016_s0 = scalar_lea.vmem %s1369_s13, 256 }
  0x5f   : > { %838 = vmatpush3.bf16.msra.mxu0 %v933_v1  ;;  %v372_v7 = vld [vmem:[%s351_s30] sm:$0x7]  ;;  %p1017_p3 = scmp.ne.s32.totalorder %s1369_s13, %s1016_s0  ;;  %p1448_p12 = scmp.ne.s32.totalorder %s1439_s10, 0 }
  0x60   : > { %851 = vmatprep.subr.bf16.mxu0 %v932_v0  ;;  %v506_v8 = vunpack.c.l.bf16 %v372_v7  ;;  %s1110_s14 = smov [#allocation7]  }
  0x61   : > { %p1018_p13 = pnand %p1017_p3, %p1448_p12  ;;  %s1020_s17 = sshll.u32 %s1110_s14, 4  ;;  %s1021_s17 = int_to_ptr.vmem [resolvable:$false] %s1020_s17 }
  0x62   : > { %840 = vmatmul.mubr.msk.bf16.vlgmr.msra.gmra.mrb[0].mxu0 %vm401_vm0, %v935_v3  ;;  %v508_v9 = vsel %vm507_vm2, %v506_v8, 0.0  ;;  %s1022_s24 = scalar_lea.vmem %s1021_s17, 512  ;;  %p1023_p10 = scmp.lt.s32.totalorder %s1369_s13, %s1021_s17 }
  0x63   : > { %852 = vmatpush3.bf16.msra.mxu0 %v932_v0  ;;  %855 = vmatprep.mubr.msk.bf16.mxu0 %vm401_vm0, %v936_v4  ;;  %p1019_p7 = pneg %p1018_p13  ;;  %p1024_p9 = scmp.lt.s32.totalorder %s1022_s24, %s1016_s0 }
  0x64   : > { %853 = vmatprep.subr.bf16.mxu0 %v933_v1  ;;  %509 = vadd.xlane.f32.xlu0 %v508_v9 }
  0x65   : > { %p1025_p11 = por %p1024_p9, %p1023_p10 }
  0x67   : > { %854 = vmatpush3.bf16.msra.mxu0 %v933_v1  ;;  %p1026_p1 = pnand %p1025_p11, %p1019_p7 }
  0x6a   : > { %856 = vmatmul.mubr.msk.bf16.vlgmr.msra.gmra.mrb[4].mxu0 %vm401_vm0, %v937_v5 }
 0x135   : > { %v841_v11 = vpop.f32.mrb[0].mxu0 }
 0x136   : > { %v451_v12 = vadd.f32 %v841_v11, %v823_v10  ;;  %v442_v13 = vpop.f32.mrb[1].mxu0 }
 0x137   : > { %v443_v14 = vadd.f32 %v823_v10, %v442_v13  ;;  %v842_v15 = vpop.f32.mrb[2].mxu0 }
 0x138   : > { %938 = vtanh.f32 %v451_v12  ;;  %v454_v16 = vadd.f32 %v842_v15, %v823_v10  ;;  %v445_v17 = vpop.f32.mrb[3].mxu0 }
 0x139   : > { %940 = vtanh.f32 %v443_v14  ;;  %v446_v18 = vadd.f32 %v823_v10, %v445_v17 }
 0x13a   : > { %942 = vtanh.f32 %v454_v16 }
 0x13b   : > { %944 = vtanh.f32 %v446_v18 }
 0x13d   : > { %v857_v25 = vpop.f32.mrb[4].mxu0 }
 0x13e   : > { %v597_v26 = vadd.f32 %v857_v25, %v823_v10  ;;  %v588_v27 = vpop.f32.mrb[5].mxu0 }
 0x13f   : > { %v589_v28 = vadd.f32 %v823_v10, %v588_v27  ;;  %v858_v29 = vpop.f32.mrb[6].mxu0 }
 0x140   : > { %946 = vtanh.f32 %v597_v26  ;;  %v600_v30 = vadd.f32 %v858_v29, %v823_v10  ;;  %v591_v31 = vpop.f32.mrb[7].mxu0 }
 0x141   : > { %948 = vtanh.f32 %v589_v28  ;;  %v592_v32 = vadd.f32 %v823_v10, %v591_v31 }
 0x142   : > { %v939_v19 = vpop.eup %938  ;;  %950 = vtanh.f32 %v600_v30 }
 0x143   : > { %v941_v20 = vpop.eup %940  ;;  %952 = vtanh.f32 %v592_v32 }
 0x144   : > { %v943_v21 = vpop.eup %942 }
 0x145   : > { %v945_v22 = vpop.eup %944  ;;  %v462_v23 = vpack.c.bf16 %v943_v21, %v939_v19 }
 0x146   : > { %v461_v24 = vpack.c.bf16 %v945_v22, %v941_v20 }
 0x148   : > { %844 = vmatpush3.bf16.msra.mxu1 %v461_v24 }
 0x149   : > { %845 = vmatprep.subr.bf16.mxu1 %v1108_v6 }
 0x14a   : > { %v947_v33 = vpop.eup %946 }
 0x14b   : > { %v949_v34 = vpop.eup %948  ;;  %v608_v35 = vsel %vm401_vm0, %v947_v33, 0.0 }
 0x14c   : > { %846 = vmatpush3.bf16.msra.mxu1 %v462_v23  ;;  %v951_v36 = vpop.eup %950  ;;  %v607_v37 = vsel %vm401_vm0, %v949_v34, 0.0 }
 0x14d   : > { %v953_v38 = vpop.eup %952  ;;  %v609_v39 = vadd.f32 %v608_v35, %v607_v37  ;;  %v611_v40 = vsel %vm401_vm0, %v951_v36, 0.0 }
 0x14e   : > { %v610_v41 = vsel %vm401_vm0, %v953_v38, 0.0 }
 0x14f   : > { %848 = vmatmul.mubr.msk.bf16.vlgmr.msra.gmra.mrb[0].mxu1 %vm401_vm0, %v372_v7  ;;  %v613_v42 = vmul.f32 0.5, %v609_v39  ;;  %v612_v43 = vadd.f32 %v611_v40, %v610_v41 }
 0x151   : > { %v614_v44 = vmul.f32 0.5, %v612_v43  ;;  %615 = vst.msk [vmem:[%s347_s19] sm:$0xff] %vm401_vm0, %v613_v42 }
 0x153   : > { %616 = vst.msk [vmem:[%s347_s19 + $0x8] sm:$0xff] %vm401_vm0, %v614_v44 }
 0x154   : > { %1029 = shalt.err (!%p1026_p1)
}
 0x155   : > { %s1030_s15 = scalar_lea.hbm %s1367_s16, 256  ;;  %s1034_s27 = scalar_lea.hbm %s1429_s6, 512 }
 0x156   : > { %p1031_p6 = scmp.ne.s32.totalorder %s1367_s16, %s1030_s15  ;;  %p1035_p4 = scmp.lt.u32.totalorder %s1367_s16, %s1429_s6 }
 0x157   : > { %p1036_p8 = scmp.lt.u32.totalorder %s1034_s27, %s1030_s15  ;;  %p1038_p3 = scmp.lt.u32.totalorder %s1030_s15, %s1367_s16 }
 0x158   : > { %p1032_p2 = pnand %p1031_p6, %p1448_p12 }
 0x159   : > { %p1037_p0 = por %p1036_p8, %p1035_p4 }
 0x15a   : > { %p1033_p5 = pneg %p1032_p2 }
 0x15b   : > { %p1039_p13 = por %p1038_p3, %p1037_p0 }
 0x15d   : > { %p1040_p7 = pnand %p1039_p13, %p1033_p5 }
 0x15f   : > { %1043 = shalt.err (!%p1040_p7)
}
 0x160   : > { %s1111_s7 = smov 128   ;;  %s1112_s8 = smov 8   ;;  %v510_v45 = vpop.xlane.xlu0 %509 }
 0x161   : > { %863 = dma.vmem_to_hbm [thread:$0]  (%p1448_p12), %s1369_s13, 256, %s1367_s16, %s622_s18, %s1111_s7, %s1111_s7, %s1112_s8   ;;  %v511_v46 = vadd.f32 0.0001, %v510_v45 }
 0x162   : > { %s801_s0 = sshll.u32 %s1345_s9, 3 }
 0x163   : > { %954 = vrcp.f32 %v511_v46  ;;  %s356_s24 = scalar_lea.vmem %s1428_s5, %s801_s0 }
 0x16d   : > { %v955_v47 = vpop.eup %954 }
 0x222   : > { %v500_v48 = vpop.f32.mrb[0].mxu1 }
 0x223   : > { %v513_v49 = vmul.f32 %v955_v47, %v500_v48  ;;  %v849_v50 = vpop.f32.mrb[1].mxu1 }
 0x224   : > { %v503_v51 = vpop.f32.mrb[2].mxu1 }
 0x225   : > { %514 = vst.msk [vmem:[%s356_s24] sm:$0x1f] %vm507_vm2, %v513_v49  ;;  %v850_v52 = vpop.f32.mrb[3].mxu1 }
 0x226 PF: > { %s662_s10 = sand.u32 1, %s1082_s21   ;;  %p1449_p12 = scmp.ne.s32.totalorder %s1440_s12, 0 }
 0x227   : > { %p1450_p10 = scmp.ge.s32.totalorder %s1102_s26, 2  ;;  %s663_s28 = scalar_lea.sflag [#allocation4], %s662_s10 }
 0x229   : > { %p873_p9 = pnand %p1450_p10, %p1449_p12 }
 0x22b   : > { %1077 = dma.done.wait (!%p873_p9), %s663_s28, 256  }
 0x22c   : > { %1079 = vsyncadd (!%p873_p9), %s663_s28, 4294967040  ;;  %s26_s26 = sadd.s32 1, %s1102_s26   ;;  %s1451_s9 = sld [smem:[#allocation11_spill]] }
 0x22d   : > { %p23_p11 = scmp.ge.s32.totalorder %s26_s26, 4   ;;  %s1452_s21 = smov %s1086_s22 }
 0x22e   : > { %s1453_s22 = smov %s1090_s23  ;;  %s1454_s23 = smov %s1204_s11 }
 0x22f   : > { %s1455_s24 = smov %s1098_s25  ;;  %25 = sbr.rel (!%p23_p11) target bundleno = 10 (0xa), region = 117 }
 0x232   : > { %s1456_s25 = smov %s1451_s9 }
 0x236   :  { %668 = vsyncpa [#allocation3], 1 }
 0x237   :  { %670 = vsyncpa [#allocation3 + $0x1], 1 }
 0x238   :  { %671 = vsyncpa [#allocation6], 1 }
 0x239   :  { %673 = vsyncpa [#allocation6 + $0x1], 1 }
 0x23a   :  { %674 = vsyncpa [#allocation4], 1 }
 0x23b   :  { %676 = vsyncpa [#allocation4 + $0x1], 1 }

</bundles_post_ra>
